<compile_context>
chip_gen: v6e
topology: v6e:2x2x1
jax: 0.10.0
libtpu: 0.0.40
codegen_flags: <defaults>
</compile_context>

<pallas_src>
import functools

import jax
import jax.numpy as jnp
from jax.experimental import pallas as pl
from jax.experimental.pallas import tpu as pltpu


def _triplet_loss_kernel(a_ref, p_ref, n_ref, o_ref, acc_ref, *,
                         margin, batch, block_rows):
    i = pl.program_id(0)

    @pl.when(i == 0)
    def _init():
        acc_ref[0, 0] = jnp.float32(0.0)

    a = a_ref[...].astype(jnp.float32)
    p = p_ref[...].astype(jnp.float32)
    n = n_ref[...].astype(jnp.float32)

    dp = a - p
    dn = a - n
    # Single fused cross-lane reduction over the feature (lane) axis.
    delta = jnp.sum(dp * dp - dn * dn, axis=1, keepdims=True)     # (TB, 1)

    loss = jnp.maximum(delta + jnp.float32(margin), 0.0)          # (TB, 1)

    # Mask out rows past the true batch size (batch was padded to a
    # multiple of the tile size in the wrapper).
    row = i * block_rows + jax.lax.broadcasted_iota(jnp.int32, loss.shape, 0)
    loss = jnp.where(row < batch, loss, 0.0)

    acc_ref[0, 0] += jnp.sum(loss)

    @pl.when(i == pl.num_programs(0) - 1)
    def _finalize():
        o_ref[0, 0] = acc_ref[0, 0] / jnp.float32(batch)


def _round_up(x, m):
    return ((x + m - 1) // m) * m


def triplet_loss_pallas(anchor, positive, negative, margin=0.2):
    """Pallas TPU implementation of the PyTorch `triplet_loss` forward."""
    assert anchor.shape == positive.shape == negative.shape
    assert anchor.ndim == 2, "expected (batch, feature) embeddings"
    B, D = anchor.shape

    # Lane-dense feature axis: pad D up to a multiple of 128 with zeros.
    D_pad = max(128, _round_up(D, 128))

    # Batch tile: multiple of 8 (f32 sublane). Cap each input block at ~2 MiB
    # so 3 inputs x 2 pipeline buffers (~12 MiB) fits the default scoped VMEM
    # on every generation (v5e 16 MiB, v6e/v7x 32 MiB).
    target_block_bytes = 2 * 1024 * 1024
    tb = max(8, (target_block_bytes // (D_pad * 4)) // 8 * 8)
    tb = min(tb, 512)                       # amortizes ~0.35 us/step overhead
    tb = min(tb, _round_up(B, 8))           # don't tile past the (padded) batch
    B_pad = _round_up(B, tb)

    def _pad(x):
        x = x.astype(jnp.float32)
        if B_pad != B or D_pad != D:
            x = jnp.pad(x, ((0, B_pad - B), (0, D_pad - D)))
        return x

    a = _pad(anchor)
    p = _pad(positive)
    n = _pad(negative)

    kernel = functools.partial(
        _triplet_loss_kernel, margin=float(margin), batch=B, block_rows=tb
    )

    # TODO(synk): on v7x a leading size-2 "parallel" grid axis with per-core
    # partial sums would use both TensorCores; single-TC loop kept for clarity.
    out = pl.pallas_call(
        kernel,
        out_shape=jax.ShapeDtypeStruct((1, 1), jnp.float32),
        grid=(B_pad // tb,),
        in_specs=[
            pl.BlockSpec((tb, D_pad), lambda i: (i, 0)),
            pl.BlockSpec((tb, D_pad), lambda i: (i, 0)),
            pl.BlockSpec((tb, D_pad), lambda i: (i, 0)),
        ],
        out_specs=pl.BlockSpec(memory_space=pltpu.SMEM),
        scratch_shapes=[pltpu.SMEM((1, 1), jnp.float32)],
        compiler_params=pltpu.CompilerParams(
            dimension_semantics=("arbitrary",)),
    )(a, p, n)

    return out[0, 0]  # scalar, matches PyTorch loss.mean()


def _reference(anchor, positive, negative, margin=0.2):
    pos_dist = jnp.sum((anchor - positive) ** 2, axis=1)
    neg_dist = jnp.sum((anchor - negative) ** 2, axis=1)
    return jnp.mean(jnp.maximum(pos_dist - neg_dist + margin, 0.0))


if __name__ == "__main__":
    key = jax.random.PRNGKey(0)
    k1, k2, k3 = jax.random.split(key, 3)

    B, D = 8, 32  # small embedding batch (non-multiple-of-128 feature dim)
    anchor = jax.random.normal(k1, (B, D), dtype=jnp.float32)
    positive = jax.random.normal(k2, (B, D), dtype=jnp.float32)
    negative = jax.random.normal(k3, (B, D), dtype=jnp.float32)

    loss = triplet_loss_pallas(anchor, positive, negative, margin=0.2)
    jax.block_until_ready(loss)

    ref = _reference(anchor, positive, negative, margin=0.2)
    assert jnp.allclose(loss, ref, atol=1e-5, rtol=1e-5), (loss, ref)

    # Extra check: batch not divisible by the tile / odd sizes still correct.
    B2, D2 = 13, 70
    a2 = jax.random.normal(k1, (B2, D2), dtype=jnp.float32)
    p2 = jax.random.normal(k2, (B2, D2), dtype=jnp.float32)
    n2 = jax.random.normal(k3, (B2, D2), dtype=jnp.float32)
    loss2 = triplet_loss_pallas(a2, p2, n2, margin=0.2)
    jax.block_until_ready(loss2)
    ref2 = _reference(a2, p2, n2, margin=0.2)
    assert jnp.allclose(loss2, ref2, atol=1e-5, rtol=1e-5), (loss2, ref2)

    print("KERNEL_OK")
</pallas_src>

<mosaic_0001>
module attributes {stable_mosaic.version = 11 : i64} {
  func.func @_triplet_loss_kernel(%arg0: i32, %arg1: memref<8x128xf32, #tpu.memory_space<vmem>>, %arg2: memref<8x128xf32, #tpu.memory_space<vmem>>, %arg3: memref<8x128xf32, #tpu.memory_space<vmem>>, %arg4: memref<1x1xf32, #tpu.memory_space<smem>>, %arg5: memref<1x1xf32, #tpu.memory_space<smem>>) attributes {dimension_semantics = [#tpu.dimension_semantics<arbitrary>], iteration_bounds = array<i64: 1>, scalar_prefetch = 0 : i64, scratch_operands = 1 : i64, tpu.core_type = #tpu.core_type<tc>, window_params = [{transform_indices = @transform_0, window_bounds = array<i64: 8, 128>}, {transform_indices = @transform_1, window_bounds = array<i64: 8, 128>}, {transform_indices = @transform_2, window_bounds = array<i64: 8, 128>}, {transform_indices = @transform_3, window_bounds = array<i64: 1, 1>}]} {
    %c0_i32 = arith.constant 0 : i32
    %0 = arith.cmpi eq, %arg0, %c0_i32 : i32
    %1 = arith.extui %0 : i1 to i32
    %c0_i32_0 = arith.constant 0 : i32
    %2 = arith.cmpi ne, %1, %c0_i32_0 : i32
    scf.if %2 {
      %cst_17 = arith.constant 0.000000e+00 : f32
      %c0_18 = arith.constant 0 : index
      %c0_19 = arith.constant 0 : index
      %35 = memref.load %arg5[%c0_18, %c0_19] : memref<1x1xf32, #tpu.memory_space<smem>>
      memref.store %cst_17, %arg5[%c0_18, %c0_19] : memref<1x1xf32, #tpu.memory_space<smem>>
    } else {
    }
    %c0 = arith.constant 0 : index
    %c0_1 = arith.constant 0 : index
    %3 = vector.load %arg1[%c0, %c0_1] : memref<8x128xf32, #tpu.memory_space<vmem>>, vector<8x128xf32>
    %c0_2 = arith.constant 0 : index
    %c0_3 = arith.constant 0 : index
    %4 = vector.load %arg2[%c0_2, %c0_3] : memref<8x128xf32, #tpu.memory_space<vmem>>, vector<8x128xf32>
    %c0_4 = arith.constant 0 : index
    %c0_5 = arith.constant 0 : index
    %5 = vector.load %arg3[%c0_4, %c0_5] : memref<8x128xf32, #tpu.memory_space<vmem>>, vector<8x128xf32>
    %6 = arith.subf %3, %4 : vector<8x128xf32>
    %7 = arith.subf %3, %5 : vector<8x128xf32>
    %8 = arith.mulf %6, %6 : vector<8x128xf32>
    %9 = arith.mulf %7, %7 : vector<8x128xf32>
    %10 = arith.subf %8, %9 : vector<8x128xf32>
    %cst = arith.constant dense<0.000000e+00> : vector<8xf32>
    %11 = vector.multi_reduction <add>, %10, %cst [1] : vector<8x128xf32> to vector<8xf32>
    %12 = vector.shape_cast %11 : vector<8xf32> to vector<8x1xf32>
    %cst_6 = arith.constant 2.000000e-01 : f32
    %13 = vector.broadcast %cst_6 : f32 to vector<8x1xf32>
    %14 = arith.addf %12, %13 : vector<8x1xf32>
    %cst_7 = arith.constant 0.000000e+00 : f32
    %15 = vector.broadcast %cst_7 : f32 to vector<8x1xf32>
    %16 = arith.maximumf %14, %15 : vector<8x1xf32>
    %c8_i32 = arith.constant 8 : i32
    %17 = arith.muli %arg0, %c8_i32 : i32
    %18 = tpu.iota {dimensions = array<i32: 0>} : vector<8x1xi32>
    %19 = vector.broadcast %17 : i32 to vector<8x1xi32>
    %20 = arith.addi %19, %18 : vector<8x1xi32>
    %c8_i32_8 = arith.constant 8 : i32
    %21 = vector.broadcast %c8_i32_8 : i32 to vector<8x1xi32>
    %22 = arith.cmpi slt, %20, %21 : vector<8x1xi32>
    %cst_9 = arith.constant 0.000000e+00 : f32
    %23 = vector.broadcast %cst_9 : f32 to vector<8x1xf32>
    %24 = arith.select %22, %16, %23 : vector<8x1xi1>, vector<8x1xf32>
    %c0_10 = arith.constant 0 : index
    %c0_11 = arith.constant 0 : index
    %25 = memref.load %arg5[%c0_10, %c0_11] : memref<1x1xf32, #tpu.memory_space<smem>>
    %26 = vector.shape_cast %24 : vector<8x1xf32> to vector<1x8x1xf32>
    %cst_12 = arith.constant dense<0.000000e+00> : vector<1xf32>
    %27 = vector.multi_reduction <add>, %26, %cst_12 [1, 2] : vector<1x8x1xf32> to vector<1xf32>
    %28 = vector.shape_cast %27 : vector<1xf32> to vector<1x1x1xf32>
    %29 = vector.extract %28[0, 0, 0] : f32 from vector<1x1x1xf32>
    %30 = arith.addf %25, %29 : f32
    %c0_13 = arith.constant 0 : index
    %c0_14 = arith.constant 0 : index
    %31 = memref.load %arg5[%c0_13, %c0_14] : memref<1x1xf32, #tpu.memory_space<smem>>
    memref.store %30, %arg5[%c0_13, %c0_14] : memref<1x1xf32, #tpu.memory_space<smem>>
    %c0_i32_15 = arith.constant 0 : i32
    %32 = arith.cmpi eq, %arg0, %c0_i32_15 : i32
    %33 = arith.extui %32 : i1 to i32
    %c0_i32_16 = arith.constant 0 : i32
    %34 = arith.cmpi ne, %33, %c0_i32_16 : i32
    scf.if %34 {
      %c0_17 = arith.constant 0 : index
      %c0_18 = arith.constant 0 : index
      %35 = memref.load %arg5[%c0_17, %c0_18] : memref<1x1xf32, #tpu.memory_space<smem>>
      %cst_19 = arith.constant 8.000000e+00 : f32
      %36 = arith.divf %35, %cst_19 : f32
      %c0_20 = arith.constant 0 : index
      %c0_21 = arith.constant 0 : index
      %37 = memref.load %arg4[%c0_20, %c0_21] : memref<1x1xf32, #tpu.memory_space<smem>>
      memref.store %36, %arg4[%c0_20, %c0_21] : memref<1x1xf32, #tpu.memory_space<smem>>
    } else {
    }
    return
  }
  func.func @transform_0(%arg0: i32) -> (i32, i32) {
    %c0_i32 = arith.constant 0 : i32
    %c0_i32_0 = arith.constant 0 : i32
    return %arg0, %c0_i32 : i32, i32
  }
  func.func @transform_1(%arg0: i32) -> (i32, i32) {
    %c0_i32 = arith.constant 0 : i32
    %c0_i32_0 = arith.constant 0 : i32
    return %arg0, %c0_i32 : i32, i32
  }
  func.func @transform_2(%arg0: i32) -> (i32, i32) {
    %c0_i32 = arith.constant 0 : i32
    %c0_i32_0 = arith.constant 0 : i32
    return %arg0, %c0_i32 : i32, i32
  }
  func.func @transform_3(%arg0: i32) -> (i32, i32) {
    %c0_i32 = arith.constant 0 : i32
    %c0_i32_0 = arith.constant 0 : i32
    %c0_i32_1 = arith.constant 0 : i32
    return %c0_i32, %c0_i32_0 : i32, i32
  }
}

</mosaic_0001>

<bundles_post_ra>
// kernel: tpu_custom_call.1
= control target key start
LH: loop header
LB: loop body
LE: loop exit
PB: predicated region body
PF: predicated region fallthrough
CT: control target
= control target key end

     0   :  { %8 = vsyncpa [#allocation4], 0  ;;  %s230_s0 = inlined_call_operand.hbm [shape: f32[8,128], index: 0, kind: input, shape index: {}]   ;;  %s231_s1 = inlined_call_operand.hbm [shape: f32[8,128], index: 1, kind: input, shape index: {}]   ;;  %s232_s2 = inlined_call_operand.hbm [shape: f32[8,128], index: 2, kind: input, shape index: {}]   ;;  %s233_s3 = inlined_call_operand.hbm [shape: f32[1,1], index: 3, kind: output, shape index: {}]  }
   0x1   :  { %9 = vsyncpa [#allocation7], 0 }
   0x2   :  { %10 = vsyncpa [#allocation5], 0  ;;  %s194_s12 = smov [#allocation6]   ;;  %s195_s14 = smov [#allocation3]  }
   0x3   :  { %s27_s13 = sshll.u32 %s194_s12, 4  ;;  %s17_s15 = sshll.u32 %s195_s14, 4  ;;  %s28_s13 = int_to_ptr.vmem [resolvable:$true] %s27_s13  ;;  %s18_s15 = int_to_ptr.vmem [resolvable:$true] %s17_s15 }
   0x4   :  { %s128_s16 = scalar_lea.vmem %s28_s13, 128  ;;  %p133_p1 = scmp.lt.s32.totalorder %s28_s13, %s28_s13 }
   0x5   :  { %p129_p0 = scmp.ne.s32.totalorder %s28_s13, %s128_s16  ;;  %p134_p2 = scmp.lt.s32.totalorder %s128_s16, %s128_s16 }
   0x7   :  { %p135_p3 = por %p134_p2, %p133_p1 }
   0x9   :  { %p136_p4 = pnand %p135_p3, %p129_p0 }
   0xb   :  { %139 = shalt.err (!%p136_p4)
}
   0xc   :  { %30 = dma.hbm_to_vmem [thread:$0]  %s231_s1, 128, %s28_s13, [#allocation7]  }
   0xd   :  { %s148_s19 = scalar_lea.vmem %s18_s15, 128  ;;  %p153_p6 = scmp.lt.s32.totalorder %s18_s15, %s18_s15 }
   0xe   :  { %p149_p5 = scmp.ne.s32.totalorder %s18_s15, %s148_s19  ;;  %p154_p7 = scmp.lt.s32.totalorder %s148_s19, %s148_s19 }
  0x10   :  { %p155_p8 = por %p154_p7, %p153_p6 }
  0x12   :  { %p156_p9 = pnand %p155_p8, %p149_p5 }
  0x14   :  { %159 = shalt.err (!%p156_p9)
}
  0x15   :  { %20 = dma.hbm_to_vmem [thread:$0]  %s230_s0, 128, %s18_s15, [#allocation4]  }
  0x16   :  { %s196_s22 = smov [#allocation8]  }
  0x17   :  { %s37_s23 = sshll.u32 %s196_s22, 4  ;;  %s38_s23 = int_to_ptr.vmem [resolvable:$true] %s37_s23 }
  0x18   :  { %s168_s24 = scalar_lea.vmem %s38_s23, 128  ;;  %p173_p11 = scmp.lt.s32.totalorder %s38_s23, %s38_s23 }
  0x19   :  { %p169_p10 = scmp.ne.s32.totalorder %s38_s23, %s168_s24  ;;  %p174_p12 = scmp.lt.s32.totalorder %s168_s24, %s168_s24 }
  0x1b   :  { %p175_p13 = por %p174_p12, %p173_p11 }
  0x1d   :  { %p176_p0 = pnand %p175_p13, %p169_p10 }
  0x1f   :  { %179 = shalt.err (!%p176_p0)
}
  0x20   :  { %40 = dma.hbm_to_vmem [thread:$0]  %s232_s2, 128, %s38_s23, [#allocation7]  }
  0x21   :  { %188 = dma.done.wait [#allocation4], 128  }
  0x22   :  { %189 = vsyncadd [#allocation4], 4294967168 }
  0x23   :  { %190 = dma.done.wait [#allocation7], 256  }
  0x24   :  { %191 = vsyncadd [#allocation7], 4294967040  ;;  %v56_v0 = vld [vmem:[#allocation3] sm:$0xff]  ;;  %v57_v1 = vld [vmem:[#allocation6] sm:$0xff]  ;;  %vm76_vm0 = vcmask 7168   ;;  %s197_s26 = smov [#allocation9]  }
  0x25   :  { %v58_v2 = vld [vmem:[#allocation8] sm:$0xff]  ;;  %v59_v3 = vsub.f32 %v56_v0, %v57_v1 }
  0x26   :  { %v60_v4 = vsub.f32 %v56_v0, %v58_v2 }
  0x27   :  { %v61_v5 = vmul.f32 %v59_v3, %v59_v3 }
  0x28   :  { %v62_v6 = vmul.f32 %v60_v4, %v60_v4 }
  0x2a   :  { %v63_v7 = vsub.f32 %v61_v5, %v62_v6 }
  0x2c   :  { %64 = vadd.xlane.f32.xlu0 %v63_v7 }
  0xb5   :  { %v65_v8 = vpop.xlane.xlu0 %64 }
  0xb6   :  { %v66_v9 = vadd.f32 0.2, %v65_v8 }
  0xb8   :  { %v67_v10 = vmax.f32 %v66_v9, 0.0 }
  0xba   :  { %v77_v11 = vsel %vm76_vm0, %v67_v10, 0.0 }
  0xbb   :  { %78 = vadd.xlane.f32.xlu0 %v77_v11 }
 0x144   :  { %v79_v12 = vpop.xlane.xlu0 %78 }
 0x145   :  { %v80_v13 = vrot.slane %v79_v12, 4 }
 0x147   :  { %v81_v14 = vadd.f32 %v80_v13, %v79_v12 }
 0x149   :  { %v82_v15 = vrot.slane %v81_v14, 2 }
 0x14b   :  { %v83_v16 = vadd.f32 %v82_v15, %v81_v14 }
 0x14d   :  { %v84_v17 = vrot.slane %v83_v16, 1 }
 0x14f   :  { %v85_v18 = vadd.f32 %v84_v17, %v83_v16 }
 0x151   :  { %114 = vpush %v85_v18 }
 0x182   :  { %s115_s0 = spop %114 }
 0x183   :  { %s96_s2 = smul.f32 0.125, %s115_s0 }
 0x185   :  { %98 = sst [smem:[#allocation9]] %s96_s2 }
 0x186   :  { %106 = dma.smem_to_hbm %s197_s26, 16, %s233_s3, [#allocation5]  }
 0x187   :  { %192 = dma.done.wait [#allocation5], 16  }
 0x188   :  { %193 = vsyncadd [#allocation5], 4294967280 }
 0x189   :  { %110 = sfence }
 0x18a   :  { %111 = vsyncpa [#allocation4], 1 }
 0x18b   :  { %112 = vsyncpa [#allocation7], 1 }
 0x18c   :  { %113 = vsyncpa [#allocation5], 1 }

</bundles_post_ra>
